<compile_context>
chip_gen: v5e
topology: v5e:2x2
jax: 0.10.0
libtpu: 0.0.40
codegen_flags: <defaults>
</compile_context>

<pallas_src>
import functools
import math

import jax
import jax.numpy as jnp
from jax import lax
from jax.experimental import pallas as pl
from jax.experimental.pallas import tpu as pltpu


MXU_BF16 = False                      # flip on v6e/v7x for ~2-3x MXU throughput (f32 acc)
_VMEM_BUDGET = 12 * 1024 * 1024       # tile budget: fits v5e's 16-MiB scoped default
_VMEM_LIMIT = 32 * 1024 * 1024        # explicit scoped-VMEM limit, legal on v5e/v6e/v7x


def _cparams(n_parallel):
    return pltpu.CompilerParams(
        dimension_semantics=("parallel",) * n_parallel,
        vmem_limit_bytes=_VMEM_LIMIT)


def _mxu(v):
    return v.astype(jnp.bfloat16) if MXU_BF16 else v


def _round_up(x, m):
    return ((x + m - 1) // m) * m


def _fit_tile(M, need_fn, tm_max=512, budget=_VMEM_BUDGET):
    """Largest row tile whose double-buffered blocks (incl. the 2x-buffered resident
    weight) fit a budget sized for v5e's 16-MiB scoped-VMEM default."""
    if M <= tm_max:
        return M                      # full dim -> always a legal BlockSpec
    tm = tm_max
    while tm > 8 and need_fn(tm) > budget:
        tm //= 2
    return max(tm, 8)


def _channel_chunks(C):
    """Second parallel grid axis over lane-aligned 128-wide channel tiles (keeps both
    v7x TensorCores busy when batch is tiny); single full block otherwise."""
    if C > 128 and C % 128 == 0:
        return C // 128, 128
    return 1, C


# -----------------------------------------------------------------------------
# Spec module: LearnablePositionalEmbedding.forward(x) == weight[:, :x.shape[1], :]
# -----------------------------------------------------------------------------
def learnable_positional_embedding(pe, seq_len):
    """pe: (1, max_len, d_model) learnable parameter -> (1, seq_len, d_model).

    Lane-dense path: the flat (max_len*d,) slab is viewed as (rows, 128) so the copy
    uses full-lane unmasked stores; trimmed back in the wrapper."""
    _, max_len, d = pe.shape

    if d <= 128 and 128 % d == 0 and (max_len * d) % 128 == 0:
        total_rows = (max_len * d) // 128
        rows_needed = pl.cdiv(seq_len * d, 128)
        blk = min(total_rows, _round_up(rows_needed, 8))
        pe2d = pe.reshape(total_rows, 128)

        def kernel(pe_ref, o_ref):
            o_ref[...] = pe_ref[...]

        out = pl.pallas_call(
            kernel,
            out_shape=jax.ShapeDtypeStruct((blk, 128), jnp.float32),
            grid=(1,),
            in_specs=[pl.BlockSpec((blk, 128), lambda i: (0, 0))],
            out_specs=pl.BlockSpec((blk, 128), lambda i: (0, 0)),
        )(pe2d)
        return out.reshape(1, (blk * 128) // d, d)[:, :seq_len, :]

    # fallback: original-layout copy (still correct for arbitrary d)
    blk = min(max_len, _round_up(seq_len, 8))

    def kernel(pe_ref, o_ref):
        o_ref[...] = pe_ref[...]

    out = pl.pallas_call(
        kernel,
        out_shape=jax.ShapeDtypeStruct((1, blk, d), jnp.float32),
        grid=(1,),
        in_specs=[pl.BlockSpec((1, blk, d), lambda i: (0, 0, 0))],
        out_specs=pl.BlockSpec((1, blk, d), lambda i: (0, 0, 0)),
    )(pe)
    return out[:, :seq_len, :]


# -----------------------------------------------------------------------------
# Fused dense: y = act(x @ w [+ b]) [+ residual] [-> RMSNorm * rms_w]
# -----------------------------------------------------------------------------
def _act(y, name):
    if name == "none":
        return y
    if name == "tanh":
        return jnp.tanh(y)
    if name == "sigmoid":
        return 1.0 / (1.0 + jnp.exp(-y))
    if name == "softplus":
        return jnp.maximum(y, 0.0) + jnp.log(1.0 + jnp.exp(-jnp.abs(y)))
    raise ValueError(name)


def dense(x2d, w, b=None, act="none", residual=None, rms_w=None, rms_eps=1e-12):
    M, K = x2d.shape
    K2, N = w.shape
    assert K == K2
    have_b, have_res, have_rms = b is not None, residual is not None, rms_w is not None

    def need(t):
        # 2x-buffered x/out(/residual) row blocks + 2x-buffered resident weight + vectors
        return 4 * (2 * t * K + 2 * t * N * (1 + int(have_res)) + 2 * K * N + 8 * N)

    tm = _fit_tile(M, need)

    def kernel(*refs):
        o_ref = refs[-1]
        it = iter(refs[:-1])
        x_ref = next(it)
        w_ref = next(it)
        b_ref = next(it) if have_b else None
        r_ref = next(it) if have_res else None
        g_ref = next(it) if have_rms else None

        y = jnp.dot(_mxu(x_ref[...]), _mxu(w_ref[...]),
                    preferred_element_type=jnp.float32)
        if have_b:
            y = y + b_ref[...]
        y = _act(y, act)
        if have_res:
            y = y + r_ref[...]
        if have_rms:
            var = jnp.mean(y * y, axis=-1, keepdims=True)
            y = y * lax.rsqrt(var + rms_eps) * g_ref[...]
        o_ref[...] = y

    in_specs = [pl.BlockSpec((tm, K), lambda i: (i, 0)),
                pl.BlockSpec((K, N), lambda i: (0, 0))]   # weight stays VMEM-resident
    args = [x2d, w]
    if have_b:
        in_specs.append(pl.BlockSpec((1, N), lambda i: (0, 0)))
        args.append(b)
    if have_res:
        in_specs.append(pl.BlockSpec((tm, N), lambda i: (i, 0)))
        args.append(residual)
    if have_rms:
        in_specs.append(pl.BlockSpec((1, N), lambda i: (0, 0)))
        args.append(rms_w)

    return pl.pallas_call(
        kernel,
        out_shape=jax.ShapeDtypeStruct((M, N), jnp.float32),
        grid=(pl.cdiv(M, tm),),
        in_specs=in_specs,
        out_specs=pl.BlockSpec((tm, N), lambda i: (i, 0)),
        compiler_params=_cparams(1),
    )(*args)


# -----------------------------------------------------------------------------
# Fully-fused FFN: w1 + GELU(exact-erf approx) + w2 + bias + residual + RMSNorm
# -----------------------------------------------------------------------------
def _erf_approx(x):
    # Abramowitz & Stegun 7.1.26 rational approximation, |err| <= 1.5e-7 (~ f32 eps).
    a1, a2, a3, a4, a5 = 0.254829592, -0.284496736, 1.421413741, -1.453152027, 1.061405429
    p = 0.3275911
    ax = jnp.abs(x)
    t = 1.0 / (1.0 + p * ax)
    poly = t * (a1 + t * (a2 + t * (a3 + t * (a4 + t * a5))))
    e = 1.0 - poly * jnp.exp(-ax * ax)
    return jnp.where(x >= 0.0, e, -e)


def _gelu_erf(x):
    return 0.5 * x * (1.0 + _erf_approx(x * 0.7071067811865476))


def ffn_fused(x2d, w1, b1, w2, b2, residual, rms_w, rms_eps=1e-12):
    """One kernel: x@w1+b1 -> GELU -> @w2+b2 -> +residual -> RMSNorm*g.
    The (tm, 4E) hidden activation never leaves VMEM."""
    M, E = x2d.shape
    Hh = w1.shape[1]

    def need(t):
        return 4 * (6 * t * E + 2 * (E * Hh + Hh * E) + t * Hh + 8 * (Hh + E))

    tm = _fit_tile(M, need)

    def kernel(x_ref, w1_ref, b1_ref, w2_ref, b2_ref, r_ref, g_ref, o_ref):
        h = jnp.dot(_mxu(x_ref[...]), _mxu(w1_ref[...]),
                    preferred_element_type=jnp.float32) + b1_ref[...]
        h = _gelu_erf(h)
        y = jnp.dot(_mxu(h), _mxu(w2_ref[...]),
                    preferred_element_type=jnp.float32) + b2_ref[...]
        y = y + r_ref[...]
        var = jnp.mean(y * y, axis=-1, keepdims=True)
        o_ref[...] = y * lax.rsqrt(var + rms_eps) * g_ref[...]

    return pl.pallas_call(
        kernel,
        out_shape=jax.ShapeDtypeStruct((M, E), jnp.float32),
        grid=(pl.cdiv(M, tm),),
        in_specs=[
            pl.BlockSpec((tm, E), lambda i: (i, 0)),
            pl.BlockSpec((E, Hh), lambda i: (0, 0)),
            pl.BlockSpec((1, Hh), lambda i: (0, 0)),
            pl.BlockSpec((Hh, E), lambda i: (0, 0)),
            pl.BlockSpec((1, E), lambda i: (0, 0)),
            pl.BlockSpec((tm, E), lambda i: (i, 0)),
            pl.BlockSpec((1, E), lambda i: (0, 0)),
        ],
        out_specs=pl.BlockSpec((tm, E), lambda i: (i, 0)),
        compiler_params=_cparams(1),
    )(x2d, w1, b1, w2, b2, residual, rms_w)


# -----------------------------------------------------------------------------
# Fused x_proj + dt_proj + softplus  ->  (delta, B, C)
# -----------------------------------------------------------------------------
def xproj_dtproj(xc2d, x_proj_w, dt_proj_w, dt_proj_b):
    M, d_in = xc2d.shape
    NX = x_proj_w.shape[1]
    dt_rank, d_inner = dt_proj_w.shape
    d_state = (NX - dt_rank) // 2

    def need(t):
        return 4 * (2 * t * d_in + 2 * d_in * NX + 2 * dt_rank * d_inner
                    + 2 * t * (d_inner + 2 * d_state) + t * NX + 8 * d_inner)

    tm = _fit_tile(M, need)

    def kernel(x_ref, wx_ref, wd_ref, bd_ref, delta_ref, b_ref, c_ref):
        xdbl = jnp.dot(_mxu(x_ref[...]), _mxu(wx_ref[...]),
                       preferred_element_type=jnp.float32)         # (tm, NX)
        dt = xdbl[:, :dt_rank]
        d = jnp.dot(_mxu(dt), _mxu(wd_ref[...]),
                    preferred_element_type=jnp.float32) + bd_ref[...]
        delta_ref[...] = jnp.maximum(d, 0.0) + jnp.log(1.0 + jnp.exp(-jnp.abs(d)))
        b_ref[...] = xdbl[:, dt_rank:dt_rank + d_state]
        c_ref[...] = xdbl[:, dt_rank + d_state:]

    return pl.pallas_call(
        kernel,
        out_shape=(jax.ShapeDtypeStruct((M, d_inner), jnp.float32),
                   jax.ShapeDtypeStruct((M, d_state), jnp.float32),
                   jax.ShapeDtypeStruct((M, d_state), jnp.float32)),
        grid=(pl.cdiv(M, tm),),
        in_specs=[
            pl.BlockSpec((tm, d_in), lambda i: (i, 0)),
            pl.BlockSpec((d_in, NX), lambda i: (0, 0)),
            pl.BlockSpec((dt_rank, d_inner), lambda i: (0, 0)),
            pl.BlockSpec((1, d_inner), lambda i: (0, 0)),
        ],
        out_specs=(pl.BlockSpec((tm, d_inner), lambda i: (i, 0)),
                   pl.BlockSpec((tm, d_state), lambda i: (i, 0)),
                   pl.BlockSpec((tm, d_state), lambda i: (i, 0))),
        compiler_params=_cparams(1),
    )(xc2d, x_proj_w, dt_proj_w, dt_proj_b)


# -----------------------------------------------------------------------------
# Depthwise causal conv1d + SiLU  (pltpu.roll taps, no (L,L) shift matmuls)
# -----------------------------------------------------------------------------
def causal_conv_silu(x, w, b):
    """x: (B, L, C) channel-last; w: (K, C) with w[k, c] == torch_weight[c, 0, k]."""
    Bn, L, C = x.shape
    K = w.shape[0]
    n_ch, dc = _channel_chunks(C)

    def kernel(x_ref, w_ref, b_ref, o_ref):
        xv = x_ref[...]                                    # (L, dc)
        wv = w_ref[...]                                    # (K, dc)
        row = lax.broadcasted_iota(jnp.int32, (L, 1), 0)
        acc = jnp.zeros((L, dc), jnp.float32) + b_ref[...]
        for k in range(K):                                 # static unroll, tiny K
            s = K - 1 - k                                  # causal tap: y[t] += w[k]*x[t-s]
            if s == 0:
                tap = xv
            else:
                tap = pltpu.roll(xv, shift=s, axis=0)      # rolled[t] = x[t-s] (wraps)
                tap = jnp.where(row >= s, tap, 0.0)        # zero the wrapped rows
            acc = acc + tap * wv[k:k + 1, :]
        o_ref[...] = acc * (1.0 / (1.0 + jnp.exp(-acc)))   # SiLU

    return pl.pallas_call(
        kernel,
        out_shape=jax.ShapeDtypeStruct((Bn, L, C), jnp.float32),
        grid=(Bn, n_ch),
        in_specs=[
            pl.BlockSpec((None, L, dc), lambda bi, ci: (bi, 0, ci)),
            pl.BlockSpec((K, dc), lambda bi, ci: (0, ci)),
            pl.BlockSpec((1, dc), lambda bi, ci: (0, ci)),
        ],
        out_specs=pl.BlockSpec((None, L, dc), lambda bi, ci: (bi, 0, ci)),
        compiler_params=_cparams(2),
    )(x, w, b)


# -----------------------------------------------------------------------------
# Selective scan (Mamba SSM recurrence) with the SiLU(z) gate fused
# -----------------------------------------------------------------------------
def selective_scan(u, delta, A_T, Bc, Cc, D, z):
    """u, delta, z : (B, L, d_inner);  A_T: (d_state, d_inner) (A = -exp(A_log))
    Bc, Cc        : (B, L, d_state);   D : (1, d_inner)
    Returns y*SiLU(z) with  h_t = exp(dt*A)*h_{t-1} + dt*B_t*u_t,  y_t = C_t.h_t + D*u_t.

    dA = exp(delta*A) and dBu = B*(delta*u) are precomputed (vectorized over L) into
    VMEM scratch laid out (L, d_state*dc); the serial loop carries ONLY the multiply-add;
    the C.h reduction + D*u + SiLU(z) gate run as one vectorized, lane-dense epilogue."""
    Bn, L, d_in = u.shape
    d_state = A_T.shape[0]
    n_ch, dc = _channel_chunks(d_in)
    S = d_state

    def kernel(u_ref, dt_ref, A_ref, B_ref, C_ref, D_ref, z_ref, y_ref,
               dA_ref, dBu_ref, h_all_ref):
        u_v = u_ref[...]                                   # (L, dc)
        dt = dt_ref[...]                                   # (L, dc)
        A = A_ref[...]                                     # (S, dc)
        Bm = B_ref[...]                                    # (L, S)
        w = dt * u_v
        # hoisted off the serial path: EUP exps + outer products, vectorized over L
        for s in range(S):
            cols = slice(s * dc, (s + 1) * dc)
            dA_ref[:, cols] = jnp.exp(dt * A[s:s + 1, :])
            dBu_ref[:, cols] = Bm[:, s:s + 1] * w

        # serial recurrence: only the loop-carried multiply-add remains
        def body(t, h):
            h = dA_ref[pl.ds(t, 1), :] * h + dBu_ref[pl.ds(t, 1), :]
            h_all_ref[pl.ds(t, 1), :] = h
            return h
        lax.fori_loop(0, L, body, jnp.zeros((1, S * dc), jnp.float32))

        # vectorized epilogue: y = sum_s C[:, s]*h[:, s, :] + D*u, gated by SiLU(z)
        Cm = C_ref[...]                                    # (L, S)
        y = D_ref[...] * u_v
        for s in range(S):
            y = y + Cm[:, s:s + 1] * h_all_ref[:, s * dc:(s + 1) * dc]
        zv = z_ref[...]
        y_ref[...] = y * (zv * (1.0 / (1.0 + jnp.exp(-zv))))

    chan_spec = pl.BlockSpec((None, L, dc), lambda bi, ci: (bi, 0, ci))
    state_spec = pl.BlockSpec((None, L, d_state), lambda bi, ci: (bi, 0, 0))
    return pl.pallas_call(
        kernel,
        out_shape=jax.ShapeDtypeStruct((Bn, L, d_in), jnp.float32),
        grid=(Bn, n_ch),
        in_specs=[
            chan_spec,                                              # u
            chan_spec,                                              # delta
            pl.BlockSpec((d_state, dc), lambda bi, ci: (0, ci)),    # A_T
            state_spec,                                             # B
            state_spec,                                             # C
            pl.BlockSpec((1, dc), lambda bi, ci: (0, ci)),          # D
            chan_spec,                                              # z
        ],
        out_specs=chan_spec,
        scratch_shapes=[pltpu.VMEM((L, d_state * dc), jnp.float32)] * 3,
        compiler_params=_cparams(2),
    )(u, delta, A_T, Bc, Cc, D, z)


# -----------------------------------------------------------------------------
# Dual-value causal attention: native (B, L, E) layouts, no wrapper transposes
# -----------------------------------------------------------------------------
def dual_attention(q, k, v1, v2, num_heads):
    Bn, L, E = q.shape
    dh = E // num_heads
    scale = 1.0 / math.sqrt(dh)

    def kernel(q_ref, k_ref, v1_ref, v2_ref, o1_ref, o2_ref):
        qv, kv = q_ref[...], k_ref[...]
        v1v, v2v = v1_ref[...], v2_ref[...]
        row = lax.broadcasted_iota(jnp.int32, (L, L), 0)
        col = lax.broadcasted_iota(jnp.int32, (L, L), 1)
        # strictly-causal mask (j < i); row 0 degrades to uniform, matching the PyTorch
        # create_mask(input, 0) reference behaviour kept from the validated version.
        causal = col < row
        o1_parts, o2_parts = [], []
        for h in range(num_heads):                         # static unroll over heads
            lo, hi = h * dh, (h + 1) * dh
            s = lax.dot_general(_mxu(qv[:, lo:hi]), _mxu(kv[:, lo:hi]),
                                (((1,), (1,)), ((), ())),
                                preferred_element_type=jnp.float32) * scale
            s = jnp.where(causal, s, jnp.float32(-1e9))
            m = jnp.max(s, axis=-1, keepdims=True)
            p = jnp.exp(s - m)
            p = p / jnp.sum(p, axis=-1, keepdims=True)
            o1_parts.append(jnp.dot(_mxu(p), _mxu(v1v[:, lo:hi]),
                                    preferred_element_type=jnp.float32))
            o2_parts.append(jnp.dot(_mxu(p), _mxu(v2v[:, lo:hi]),
                                    preferred_element_type=jnp.float32))
        o1_ref[...] = jnp.concatenate(o1_parts, axis=-1)
        o2_ref[...] = jnp.concatenate(o2_parts, axis=-1)

    spec = pl.BlockSpec((None, L, E), lambda b: (b, 0, 0))
    return pl.pallas_call(
        kernel,
        out_shape=(jax.ShapeDtypeStruct((Bn, L, E), jnp.float32),
                   jax.ShapeDtypeStruct((Bn, L, E), jnp.float32)),
        grid=(Bn,),
        in_specs=[spec, spec, spec, spec],
        out_specs=(spec, spec),
        compiler_params=_cparams(1),
    )(q, k, v1, v2)


# -----------------------------------------------------------------------------
# Model pieces (glue around the kernels)
# -----------------------------------------------------------------------------
def mamba_block(x, p, add_residual):
    """Vanilla Mamba mixer (bimamba_type='none'), eval mode; returns the normed 2-D
    activation (out_proj + residual + RMSNorm fused in one kernel)."""
    Bn, L, E = x.shape
    d_inner = p['D'].shape[1]
    d_state = p['A_log_T'].shape[0]

    xz = dense(x.reshape(Bn * L, E), p['in_proj_w']).reshape(Bn, L, 2 * d_inner)
    xc, z = xz[..., :d_inner], xz[..., d_inner:]

    xc = causal_conv_silu(xc, p['conv_w'], p['conv_b'])

    delta2d, Bm2d, Cm2d = xproj_dtproj(xc.reshape(Bn * L, d_inner),
                                       p['x_proj_w'], p['dt_proj_w'], p['dt_proj_b'])
    delta = delta2d.reshape(Bn, L, d_inner)
    Bm = Bm2d.reshape(Bn, L, d_state)
    Cm = Cm2d.reshape(Bn, L, d_state)

    A_T = -jnp.exp(p['A_log_T'])                            # (d_state, d_inner)

    y = selective_scan(xc, delta, A_T, Bm, Cm, p['D'], z)   # SiLU(z) gate fused
    res2d = x.reshape(Bn * L, E) if add_residual else None
    return dense(y.reshape(Bn * L, d_inner), p['out_proj_w'],
                 residual=res2d, rms_w=p['ln1_w'])          # fused +res +RMSNorm


def mamba_layer(x, p, num_blocks):
    Bn, L, E = x.shape
    h2d = mamba_block(x, p, add_residual=(num_blocks != 1))
    # FFN: one fused kernel (w1 + GELU + w2 + bias + residual + RMSNorm)
    out2d = ffn_fused(h2d, p['ffn_w1'], p['ffn_b1'], p['ffn_w2'], p['ffn_b2'],
                      h2d, p['ffn_ln_w'])
    return out2d.reshape(Bn, L, E)


def mamba4kt_forward(params, q, c, r, cfg):
    num_skills = cfg['num_skills']
    cshft = c[:, 1:]
    rshft = r[:, 1:]
    masked_r = r * (r > -1).astype(r.dtype)
    q_input = q[:, :-1]
    c_input = c[:, :-1]
    r_input = masked_r[:, :-1]

    concept_emb = params['concept_encoder'][c_input]
    state = params['answer_encoder'][r_input] + concept_emb
    # question-difficulty branch (computed for fidelity; does not feed the output path)
    concept_diff = params['concept_diff'][c_input]
    question_difficult = params['question_difficult'][q_input]
    concept_emb = concept_emb + question_difficult * concept_diff

    state_true_emb = params['true_encoder'][c_input * r_input + num_skills * r_input]
    state_false_emb = params['false_encoder'][c_input * (1 - r_input)]

    Bn, L, E = state.shape

    # one batched MLP pass over [state | state_true | state_false]  (3x fewer launches)
    stacked = jnp.concatenate([state, state_true_emb, state_false_emb], axis=0)
    h = dense(stacked.reshape(3 * Bn * L, E), params['mlp_w0'], params['mlp_b0'],
              act="tanh")
    h = dense(h, params['mlp_w1'], params['mlp_b1']).reshape(3 * Bn, L, E)
    state, state_true, state_false = h[:Bn], h[Bn:2 * Bn], h[2 * Bn:]

    y = state
    for i in range(cfg['num_blocks']):
        y = mamba_layer(y, params['mamba'][i], cfg['num_blocks'])

    st, sf = dual_attention(y, y, state_true, state_false, cfg['num_attn_heads'])
    yc = jnp.concatenate([y, st, sf], axis=-1)
    yo = dense(yc.reshape(Bn * L, 3 * E), params['final_out_w'], params['final_out_b'])
    # dropout_layer: identity in eval mode
    yo = dense(yo, params['out_w'], params['out_b'],
               act="sigmoid").reshape(Bn, L, num_skills)
    pred = jnp.take_along_axis(yo, cshft[..., None], axis=-1)[..., 0]
    return {'pred': pred, 'true': rshft.astype(jnp.float32)}


# -----------------------------------------------------------------------------
# Deterministic parameter initialization (synthetic weights)
# -----------------------------------------------------------------------------
class KeyGen:
    def __init__(self, key):
        self.key = key

    def __call__(self):
        self.key, k = jax.random.split(self.key)
        return k


def _glorot(key, shape):
    lim = math.sqrt(6.0 / (shape[0] + shape[1]))
    return jax.random.uniform(key, shape, jnp.float32, -lim, lim)


def _uniform(key, shape, scale):
    return jax.random.uniform(key, shape, jnp.float32, -scale, scale)


def init_params(seed, cfg, max_len=512):
    kg = KeyGen(jax.random.PRNGKey(seed))
    E = cfg['embedding_size']
    H = E
    ns, nq = cfg['num_skills'], cfg['num_questions']
    d_state, d_conv, expand = cfg['d_state'], cfg['d_conv'], cfg['expand']
    d_inner = expand * E
    dt_rank = math.ceil(E / 16)

    def emb(n):
        return 0.02 * jax.random.normal(kg(), (n, E), jnp.float32)

    p = {
        # LearnablePositionalEmbedding parameter: pe = 0.1 * randn(max_len, d_model)[None]
        'pos_emb': 0.1 * jax.random.normal(kg(), (1, max_len, E), jnp.float32),
        'question_difficult': emb(nq + 1),
        'concept_diff': emb(ns + 1),
        'concept_encoder': emb(ns),
        'answer_encoder': emb(2),
        'true_encoder': emb(2 * ns + 1),
        'false_encoder': emb(2 * ns + 1),
        'mlp_w0': _glorot(kg(), (E, H)), 'mlp_b0': jnp.zeros((1, H), jnp.float32),
        'mlp_w1': _glorot(kg(), (H, H)), 'mlp_b1': jnp.zeros((1, H), jnp.float32),
        'final_out_w': _glorot(kg(), (3 * H, H)),
        'final_out_b': jnp.zeros((1, H), jnp.float32),
        'out_w': _glorot(kg(), (H, ns)),
        'out_b': jnp.zeros((1, ns), jnp.float32),
    }

    blocks = []
    for _ in range(cfg['num_blocks']):
        b = {
            'in_proj_w': _glorot(kg(), (E, 2 * d_inner)),
            'conv_w': _uniform(kg(), (d_conv, d_inner), 1.0 / math.sqrt(d_conv)),
            'conv_b': jnp.zeros((1, d_inner), jnp.float32),
            'x_proj_w': _glorot(kg(), (d_inner, dt_rank + 2 * d_state)),
            'dt_proj_w': _glorot(kg(), (dt_rank, d_inner)),
            'dt_proj_b': _uniform(kg(), (1, d_inner), 0.1),
            'A_log_T': jnp.log(jnp.broadcast_to(
                jnp.arange(1, d_state + 1, dtype=jnp.float32)[:, None],
                (d_state, d_inner))),
            'D': jnp.ones((1, d_inner), jnp.float32),
            'out_proj_w': _glorot(kg(), (d_inner, E)),
            'ln1_w': jnp.ones((1, E), jnp.float32),
            'ffn_w1': _glorot(kg(), (E, 4 * E)),
            'ffn_b1': jnp.zeros((1, 4 * E), jnp.float32),
            'ffn_w2': _glorot(kg(), (4 * E, E)),
            'ffn_b2': jnp.zeros((1, E), jnp.float32),
            'ffn_ln_w': jnp.ones((1, E), jnp.float32),
        }
        blocks.append(b)
    p['mamba'] = blocks
    return p


# -----------------------------------------------------------------------------
if __name__ == "__main__":
    cfg = dict(num_skills=16, num_questions=20, embedding_size=32, num_attn_heads=4,
               num_blocks=2, d_state=8, d_conv=4, expand=2, dropout=0.1)
    B, S = 2, 9  # 9 interactions -> the model works on L = 8 shifted steps

    params = init_params(0, cfg)

    key = jax.random.PRNGKey(0)
    kq, kc, kr = jax.random.split(key, 3)
    q = jax.random.randint(kq, (B, S), 0, cfg['num_questions'] + 1, dtype=jnp.int32)
    c = jax.random.randint(kc, (B, S), 0, cfg['num_skills'], dtype=jnp.int32)
    r = jax.random.randint(kr, (B, S), 0, 2, dtype=jnp.int32)

    # --- the spec module itself: LearnablePositionalEmbedding.forward(x) ---
    x_tokens = jnp.zeros((B, S - 1, cfg['embedding_size']), jnp.float32)
    pe = learnable_positional_embedding(params['pos_emb'], x_tokens.shape[1])
    jax.block_until_ready(pe)
    assert pe.shape == (1, S - 1, cfg['embedding_size'])
    assert bool(jnp.allclose(pe, params['pos_emb'][:, :S - 1, :]))

    # --- full Mamba4KT forward built from the Pallas kernels ---
    fwd = jax.jit(functools.partial(mamba4kt_forward, cfg=cfg))
    out = fwd(params, q, c, r)
    jax.block_until_ready(out)

    assert out['pred'].shape == (B, S - 1)
    assert out['true'].shape == (B, S - 1)
    assert bool(jnp.all(jnp.isfinite(out['pred'])))
    print("KERNEL_OK")
</pallas_src>

<mosaic_0001>
module attributes {stable_mosaic.version = 11 : i64} {
  func.func @kernel(%arg0: i32, %arg1: memref<8x128xf32, #tpu.memory_space<vmem>>, %arg2: memref<8x128xf32, #tpu.memory_space<vmem>>) attributes {dimension_semantics = [#tpu.dimension_semantics<arbitrary>], iteration_bounds = array<i64: 1>, scalar_prefetch = 0 : i64, scratch_operands = 0 : i64, tpu.core_type = #tpu.core_type<tc>, window_params = [{transform_indices = @transform_0, window_bounds = array<i64: 8, 128>}, {pipeline_mode = #tpu.pipeline_mode<synchronous>, transform_indices = @transform_1, window_bounds = array<i64: 8, 128>}]} {
    %c0 = arith.constant 0 : index
    %c0_0 = arith.constant 0 : index
    %0 = vector.load %arg1[%c0, %c0_0] : memref<8x128xf32, #tpu.memory_space<vmem>>, vector<8x128xf32>
    %c0_1 = arith.constant 0 : index
    %c0_2 = arith.constant 0 : index
    %1 = vector.load %arg2[%c0_1, %c0_2] : memref<8x128xf32, #tpu.memory_space<vmem>>, vector<8x128xf32>
    tpu.vector_store %arg2[%c0_1, %c0_2], %0 {strides = array<i32>} : memref<8x128xf32, #tpu.memory_space<vmem>>, vector<8x128xf32>,
    return
  }
  func.func @transform_0(%arg0: i32) -> (i32, i32) {
    %c0_i32 = arith.constant 0 : i32
    %c0_i32_0 = arith.constant 0 : i32
    %c0_i32_1 = arith.constant 0 : i32
    return %c0_i32, %c0_i32_0 : i32, i32
  }
  func.func @transform_1(%arg0: i32) -> (i32, i32) {
    %c0_i32 = arith.constant 0 : i32
    %c0_i32_0 = arith.constant 0 : i32
    %c0_i32_1 = arith.constant 0 : i32
    return %c0_i32, %c0_i32_0 : i32, i32
  }
}

</mosaic_0001>

<bundles_post_ra>
// kernel: tpu_custom_call.1
= control target key start
LH: loop header
LB: loop body
LE: loop exit
PB: predicated region body
PF: predicated region fallthrough
CT: control target
= control target key end

     0   :  { %6 = vsyncpa [#allocation3], 0  ;;  %s114_s0 = inlined_call_operand.hbm [shape: f32[128,128], index: 0, kind: input, shape index: {}]   ;;  %s115_s1 = inlined_call_operand.hbm [shape: f32[8,128], index: 1, kind: output, shape index: {}]  }
   0x1   :  { %7 = vsyncpa [#allocation4], 0  ;;  %s13_s8 = sshll.u32 %s114_s0, 4  ;;  %s96_s9 = smov [#allocation2]   ;;  %s14_s8 = int_to_ptr.hbm [resolvable:$true] %s13_s8 }
   0x2   :  { %s15_s10 = sshll.u32 %s96_s9, 4  ;;  %s16_s10 = int_to_ptr.vmem [resolvable:$true] %s15_s10 }
   0x3   :  { %18 = dma.hbm_to_vmem [thread:$0]  %s14_s8, 128, %s16_s10, [#allocation3]  }
   0x4   :  { %92 = dma.done.wait [#allocation3], 128  }
   0x5   :  { %93 = vsyncadd [#allocation3], 4294967168  ;;  %s97_s11 = smov [#allocation5]   ;;  %s32_s15 = sshll.u32 %s115_s1, 4  ;;  %v23_v0 = vld [vmem:[#allocation2] sm:$0xff]  ;;  %s33_s15 = int_to_ptr.hbm [resolvable:$true] %s32_s15 }
   0x6   :  { %s30_s12 = sshll.u32 %s97_s11, 4  ;;  %24 = vst [vmem:[#allocation5] sm:$0xff] %v23_v0  ;;  %s31_s12 = int_to_ptr.vmem [resolvable:$true] %s30_s12 }
   0x7   :  { %35 = dma.vmem_to_hbm [thread:$0]  %s31_s12, 128, %s33_s15, [#allocation4]  }
   0x8   :  { %94 = dma.done.wait [#allocation4], 128  }
   0x9   :  { %95 = vsyncadd [#allocation4], 4294967168 }
   0xa   :  { %40 = vsyncpa [#allocation3], 1 }
   0xb   :  { %41 = vsyncpa [#allocation4], 1 }

</bundles_post_ra>
